<compile_context>
chip_gen: v6e
topology: v6e:2x2x1
jax: 0.10.0
libtpu: 0.0.40
codegen_flags: <defaults>
</compile_context>

<pallas_src>
import functools
import math

import jax
import jax.numpy as jnp
from jax.experimental import pallas as pl
from jax.experimental.pallas import tpu as pltpu


_SQRT_2_OVER_PI = math.sqrt(2.0 / math.pi)


def _new_gelu(y):
    return 0.5 * y * (1.0 + jnp.tanh(_SQRT_2_OVER_PI * (y + 0.044715 * (y * y * y))))


def _round_up(x, m):
    return ((x + m - 1) // m) * m


def _default_tiles_and_vmem():
    """Generation-aware tile defaults and VMEM limit (with headroom)."""
    vmem_bytes = 128 * 1024 * 1024
    try:
        vmem_bytes = int(getattr(pltpu.get_tpu_info(), "vmem_capacity_bytes", vmem_bytes))
    except Exception:
        pass
    if vmem_bytes >= 100 * 1024 * 1024:
        # v5e / v6e: 128 MiB VMEM -> big tiles, high arithmetic intensity (MXU-bound).
        return (2048, 1024, 1024), 100 * 1024 * 1024
    # v7x: 64 MiB VMEM per TC -> stay well under; HBM ridge is lower anyway.
    return (1024, 1024, 1024), 48 * 1024 * 1024


def _linear_newgelu_kernel(x_ref, w_ref, b_ref, o_ref, acc_ref):
    k = pl.program_id(2)

    # Fold the bias into the accumulator init (saves a zero-store + add pass).
    @pl.when(k == 0)
    def _():
        acc_ref[...] = jnp.broadcast_to(b_ref[...], acc_ref.shape)

    # x tile: (tm, tk); w tile: (tk, tn) (weight pre-transposed once at load time).
    acc_ref[...] += jnp.dot(
        x_ref[...], w_ref[...], preferred_element_type=jnp.float32
    )

    @pl.when(k == pl.num_programs(2) - 1)
    def _():
        o_ref[...] = _new_gelu(acc_ref[...]).astype(o_ref.dtype)


class LinearNewGelu:
    """Fused NewGELU(Linear(x)).

    weight: (N, K) in torch.nn.Linear layout; bias: (N,).
    compute_dtype: MXU operand dtype (default bf16); accumulation is always f32.
    Weight casting / transposition / padding happens ONCE here (module init),
    mirroring the IPEX module's one-time fusion setup.
    """

    def __init__(self, weight, bias, *, compute_dtype=jnp.bfloat16,
                 tm=None, tn=None, tk=None, vmem_limit_bytes=None):
        (dtm, dtn, dtk), dvmem = _default_tiles_and_vmem()
        tm = dtm if tm is None else tm
        tn = dtn if tn is None else tn
        tk = dtk if tk is None else tk
        self.vmem_limit_bytes = dvmem if vmem_limit_bytes is None else vmem_limit_bytes

        N, K = weight.shape
        assert bias.shape == (N,), "bias shape mismatch"
        self.N, self.K = N, K
        self.compute_dtype = compute_dtype

        # Clamp tiles to the (aligned) problem size; lane dims stay multiples of 128,
        # sublane dims multiples of 16 (safe for f32 and bf16).
        self.tm_max = max(16, min(tm, _round_up(1, 16)) if False else min(tm, 1 << 30))
        self.tm_max = tm
        self.tn = min(tn, _round_up(N, 128))
        self.tk = min(tk, _round_up(K, 128))

        Kp = _round_up(K, self.tk)
        Np = _round_up(N, self.tn)
        self.Kp, self.Np = Kp, Np

        # One-time weight/bias preparation: cast, transpose to (K, N), zero-pad.
        w = jnp.asarray(weight).astype(compute_dtype).T  # (K, N)
        if (Kp, Np) != (K, N):
            w = jnp.pad(w, ((0, Kp - K), (0, Np - N)))
        b = jnp.asarray(bias).astype(jnp.float32).reshape(1, N)
        if Np != N:
            b = jnp.pad(b, ((0, 0), (0, Np - N)))
        self.w = w
        self.b = b

    def __call__(self, x):
        orig_shape = x.shape
        K = orig_shape[-1]
        assert K == self.K, "in_features mismatch"
        out_dtype = x.dtype

        M = int(math.prod(orig_shape[:-1])) if len(orig_shape) > 1 else 1
        x2d = x.reshape(M, K).astype(self.compute_dtype)

        tm = min(self.tm_max, _round_up(M, 16))
        Mp = _round_up(M, tm)

        # Make sure at least one `parallel` grid axis has >= 2 blocks so both
        # TensorCores on v7x get work even when M collapses to a single i-tile.
        tn = self.tn
        if Mp // tm == 1:
            while self.Np // tn < 2 and tn >= 256 and tn % 256 == 0:
                tn //= 2

        if (Mp, self.Kp) != (M, K):
            x2d = jnp.pad(x2d, ((0, Mp - M), (0, self.Kp - K)))

        n_k = self.Kp // self.tk
        grid = (Mp // tm, self.Np // tn, n_k)

        # Small-M (decode) + long K loop -> pure weight streaming: deepen w pipeline.
        if tm <= 64 and n_k >= 3:
            w_spec = pl.BlockSpec((self.tk, tn), lambda i, j, k: (k, j),
                                  pipeline_mode=pl.Buffered(3))
        else:
            w_spec = pl.BlockSpec((self.tk, tn), lambda i, j, k: (k, j))

        c_item = jnp.dtype(self.compute_dtype).itemsize
        o_item = jnp.dtype(out_dtype).itemsize
        cost = pl.CostEstimate(
            flops=2 * Mp * self.Np * self.Kp,
            transcendentals=Mp * self.Np,
            bytes_accessed=(Mp * self.Kp * c_item + self.Kp * self.Np * c_item
                            + self.Np * 4 + Mp * self.Np * o_item),
        )

        out = pl.pallas_call(
            _linear_newgelu_kernel,
            out_shape=jax.ShapeDtypeStruct((Mp, self.Np), out_dtype),
            grid_spec=pltpu.PrefetchScalarGridSpec(
                num_scalar_prefetch=0,
                grid=grid,
                in_specs=[
                    pl.BlockSpec((tm, self.tk), lambda i, j, k: (i, k)),  # x tile
                    w_spec,                                               # W (K, N) tile
                    pl.BlockSpec((1, tn), lambda i, j, k: (0, j)),        # bias tile
                ],
                out_specs=pl.BlockSpec((tm, tn), lambda i, j, k: (i, j)),
                scratch_shapes=[pltpu.VMEM((tm, tn), jnp.float32)],
            ),
            compiler_params=pltpu.CompilerParams(
                dimension_semantics=("parallel", "parallel", "arbitrary"),
                vmem_limit_bytes=self.vmem_limit_bytes,
            ),
            cost_estimate=cost,
        )(x2d, self.w, self.b)

        if (Mp, self.Np) != (M, self.N):
            out = out[:M, :self.N]
        return out.reshape(orig_shape[:-1] + (self.N,))


if __name__ == "__main__":
    # Small shapes consistent with torch.nn.Linear(in_features, out_features).
    # Deliberately NOT tile-aligned to exercise the padding / clamping paths.
    batch, seq = 2, 12
    in_features, out_features = 300, 200

    key = jax.random.PRNGKey(0)
    kx, kw, kb = jax.random.split(key, 3)

    x = jax.random.normal(kx, (batch, seq, in_features), dtype=jnp.float32)
    # torch.nn.Linear layout: W (out, in), b (out,)
    weight = jax.random.normal(kw, (out_features, in_features), dtype=jnp.float32) * 0.02
    bias = jax.random.normal(kb, (out_features,), dtype=jnp.float32) * 0.02

    # Pure-JAX reference.
    ref = _new_gelu(x @ weight.T + bias)

    # Exact f32 compute path.
    mod_f32 = LinearNewGelu(weight, bias, compute_dtype=jnp.float32)
    out_f32 = jax.block_until_ready(mod_f32(x))
    assert out_f32.shape == ref.shape, f"shape mismatch {out_f32.shape} vs {ref.shape}"
    assert jnp.allclose(out_f32, ref, atol=1e-5, rtol=1e-5), "mismatch vs reference (f32)"

    # Default bf16-MXU path (f32 accumulation) -- looser tolerance.
    mod_bf16 = LinearNewGelu(weight, bias)  # compute_dtype=bf16 by default
    out_bf16 = jax.block_until_ready(mod_bf16(x))
    assert out_bf16.shape == ref.shape
    assert jnp.allclose(out_bf16, ref, atol=3e-2, rtol=3e-2), "mismatch vs reference (bf16)"

    print("KERNEL_OK")
</pallas_src>

<mosaic_0001>
module attributes {stable_mosaic.version = 11 : i64} {
  func.func @_linear_newgelu_kernel(%arg0: i32, %arg1: i32, %arg2: i32, %arg3: memref<32x384xf32, #tpu.memory_space<vmem>>, %arg4: memref<384x128xf32, #tpu.memory_space<vmem>>, %arg5: memref<1x128xf32, #tpu.memory_space<vmem>>, %arg6: memref<32x128xf32, #tpu.memory_space<vmem>>, %arg7: memref<32x128xf32, #tpu.memory_space<vmem>>) attributes {dimension_semantics = [#tpu.dimension_semantics<parallel>, #tpu.dimension_semantics<parallel>, #tpu.dimension_semantics<arbitrary>], iteration_bounds = array<i64: 1, 2, 1>, scalar_prefetch = 0 : i64, scratch_operands = 1 : i64, tpu.core_type = #tpu.core_type<tc>, window_params = [{transform_indices = @transform_0, window_bounds = array<i64: 32, 384>}, {transform_indices = @transform_1, window_bounds = array<i64: 384, 128>}, {transform_indices = @transform_2, window_bounds = array<i64: 1, 128>}, {transform_indices = @transform_3, window_bounds = array<i64: 32, 128>}]} {
    %c0_i32 = arith.constant 0 : i32
    %0 = arith.cmpi eq, %arg2, %c0_i32 : i32
    %1 = arith.extui %0 : i1 to i32
    %c0_i32_0 = arith.constant 0 : i32
    %2 = arith.cmpi ne, %1, %c0_i32_0 : i32
    scf.if %2 {
      %c0_10 = arith.constant 0 : index
      %c0_11 = arith.constant 0 : index
      %12 = vector.load %arg5[%c0_10, %c0_11] : memref<1x128xf32, #tpu.memory_space<vmem>>, vector<1x128xf32>
      %13 = vector.shape_cast %12 : vector<1x128xf32> to vector<1x128xf32>
      %14 = vector.broadcast %13 : vector<1x128xf32> to vector<32x128xf32>
      %c0_12 = arith.constant 0 : index
      %c0_13 = arith.constant 0 : index
      %15 = vector.load %arg7[%c0_12, %c0_13] : memref<32x128xf32, #tpu.memory_space<vmem>>, vector<32x128xf32>
      tpu.vector_store %arg7[%c0_12, %c0_13], %14 {strides = array<i32>} : memref<32x128xf32, #tpu.memory_space<vmem>>, vector<32x128xf32>,
    } else {
    }
    %c0 = arith.constant 0 : index
    %c0_1 = arith.constant 0 : index
    %3 = vector.load %arg7[%c0, %c0_1] : memref<32x128xf32, #tpu.memory_space<vmem>>, vector<32x128xf32>
    %c0_2 = arith.constant 0 : index
    %c0_3 = arith.constant 0 : index
    %4 = vector.load %arg3[%c0_2, %c0_3] : memref<32x384xf32, #tpu.memory_space<vmem>>, vector<32x384xf32>
    %c0_4 = arith.constant 0 : index
    %c0_5 = arith.constant 0 : index
    %5 = vector.load %arg4[%c0_4, %c0_5] : memref<384x128xf32, #tpu.memory_space<vmem>>, vector<384x128xf32>
    %cst = arith.constant dense<0.000000e+00> : vector<32x128xf32>
    %6 = tpu.matmul %4, %5, %cst {dimension_numbers = #tpu.dot_dimension_numbers<[1], [0], [0], [1], [0, 0, 1, 1], [], []>} : vector<32x384xf32>, vector<384x128xf32>, vector<32x128xf32> -> vector<32x128xf32>
    %7 = arith.addf %3, %6 : vector<32x128xf32>
    %c0_6 = arith.constant 0 : index
    %c0_7 = arith.constant 0 : index
    %8 = vector.load %arg7[%c0_6, %c0_7] : memref<32x128xf32, #tpu.memory_space<vmem>>, vector<32x128xf32>
    tpu.vector_store %arg7[%c0_6, %c0_7], %7 {strides = array<i32>} : memref<32x128xf32, #tpu.memory_space<vmem>>, vector<32x128xf32>,
    %c0_i32_8 = arith.constant 0 : i32
    %9 = arith.cmpi eq, %arg2, %c0_i32_8 : i32
    %10 = arith.extui %9 : i1 to i32
    %c0_i32_9 = arith.constant 0 : i32
    %11 = arith.cmpi ne, %10, %c0_i32_9 : i32
    scf.if %11 {
      %c0_10 = arith.constant 0 : index
      %c0_11 = arith.constant 0 : index
      %12 = vector.load %arg7[%c0_10, %c0_11] : memref<32x128xf32, #tpu.memory_space<vmem>>, vector<32x128xf32>
      %cst_12 = arith.constant 5.000000e-01 : f32
      %13 = vector.broadcast %cst_12 : f32 to vector<32x128xf32>
      %14 = arith.mulf %13, %12 : vector<32x128xf32>
      %15 = arith.mulf %12, %12 : vector<32x128xf32>
      %16 = arith.mulf %15, %12 : vector<32x128xf32>
      %cst_13 = arith.constant 4.471500e-02 : f32
      %17 = vector.broadcast %cst_13 : f32 to vector<32x128xf32>
      %18 = arith.mulf %17, %16 : vector<32x128xf32>
      %19 = arith.addf %12, %18 : vector<32x128xf32>
      %cst_14 = arith.constant 0.797884583 : f32
      %20 = vector.broadcast %cst_14 : f32 to vector<32x128xf32>
      %21 = arith.mulf %20, %19 : vector<32x128xf32>
      %22 = math.tanh %21 : vector<32x128xf32>
      %cst_15 = arith.constant 1.000000e+00 : f32
      %23 = vector.broadcast %cst_15 : f32 to vector<32x128xf32>
      %24 = arith.addf %23, %22 : vector<32x128xf32>
      %25 = arith.mulf %14, %24 : vector<32x128xf32>
      %c0_16 = arith.constant 0 : index
      %c0_17 = arith.constant 0 : index
      %26 = vector.load %arg6[%c0_16, %c0_17] : memref<32x128xf32, #tpu.memory_space<vmem>>, vector<32x128xf32>
      tpu.vector_store %arg6[%c0_16, %c0_17], %25 {strides = array<i32>} : memref<32x128xf32, #tpu.memory_space<vmem>>, vector<32x128xf32>,
    } else {
    }
    return
  }
  func.func @transform_0(%arg0: i32, %arg1: i32, %arg2: i32) -> (i32, i32) {
    %c0_i32 = arith.constant 0 : i32
    return %arg0, %arg2 : i32, i32
  }
  func.func @transform_1(%arg0: i32, %arg1: i32, %arg2: i32) -> (i32, i32) {
    %c0_i32 = arith.constant 0 : i32
    return %arg2, %arg1 : i32, i32
  }
  func.func @transform_2(%arg0: i32, %arg1: i32, %arg2: i32) -> (i32, i32) {
    %c0_i32 = arith.constant 0 : i32
    %c0_i32_0 = arith.constant 0 : i32
    return %c0_i32, %arg1 : i32, i32
  }
  func.func @transform_3(%arg0: i32, %arg1: i32, %arg2: i32) -> (i32, i32) {
    %c0_i32 = arith.constant 0 : i32
    return %arg0, %arg1 : i32, i32
  }
}

</mosaic_0001>

<bundles_post_ra>
// kernel: tpu_custom_call.1
= control target key start
LH: loop header
LB: loop body
LE: loop exit
PB: predicated region body
PF: predicated region fallthrough
CT: control target
= control target key end

     0   :  { %8 = vsyncpa [#allocation4], 0  ;;  %s1303_s0 = inlined_call_operand.hbm [shape: f32[32,384], index: 0, kind: input, shape index: {}]   ;;  %s1304_s1 = inlined_call_operand.hbm [shape: f32[384,256], index: 1, kind: input, shape index: {}]   ;;  %s1305_s2 = inlined_call_operand.vmem [shape: f32[1,256], index: 2, kind: input, shape index: {}]   ;;  %s1306_s3 = inlined_call_operand.hbm [shape: f32[32,256], index: 3, kind: output, shape index: {}]  }
   0x1   :  { %9 = vsyncpa [#allocation7], 0 }
   0x2   :  { %11 = vsyncpa [#allocation7 + $0x1], 0 }
   0x3   :  { %12 = vsyncpa [#allocation5], 0 }
   0x4   :  { %14 = vsyncpa [#allocation5 + $0x1], 0  ;;  %s1072_s12 = smov 0   ;;  %s1074_s13 = smov 0  }
   0x5   :  { %s1076_s14 = smov 0   ;;  %s1078_s15 = smov 0  }
   0x6   :  { %s1080_s16 = smov 0   ;;  %s1082_s17 = smov 0  }
   0x7 LB: > { %1312 = sst [smem:[#allocation12_spill]] %s1039_s17  ;;  %s694_s18 = sadd.s32 4294967295, %s1039_s17   ;;  %s1039_s17 = sphi %s1082_s17, %s20_s17   ;;  %s1035_s16 = sphi %s1080_s16, %s1332_s16   ;;  %s1031_s15 = sphi %s1078_s15, %s1331_s15   ;;  %s1027_s14 = sphi %s1076_s14, %s1330_s14   ;;  %s1023_s13 = sphi %s1074_s13, %s1329_s13   ;;  %s1019_s12 = sphi %s1072_s12, %s1328_s12  }
   0x8   : > { %s695_s19 = sadd.s32 4294967294, %s1039_s17   ;;  %p83_p0 = scmp.ne.s32.totalorder %s1027_s14, %s1023_s13 }
   0x9   : > { %p84_p1 = scmp.eq.s32.totalorder %s1039_s17, 0  ;;  %p89_p2 = scmp.ne.s32.totalorder %s1023_s13, %s1019_s12 }
   0xa   : > { %p1109_p3 = scmp.eq.s32.totalorder %s694_s18, 0  ;;  %p141_p5 = scmp.eq.s32.totalorder %s694_s18, 1 }
   0xb   : > { %p1113_p4 = por %p84_p1, %p83_p0  ;;  %p147_p7 = scmp.eq.s32.totalorder %s695_s19, 1 }
   0xc   : > { %p1119_p6 = por %p1109_p3, %p89_p2  ;;  %p1123_p8 = por %p141_p5, %p83_p0 }
   0xd   : > { %p696_p9 = scmp.ge.s32.totalorder %s1039_s17, 1  ;;  %p1128_p10 = por %p147_p7, %p89_p2 }
   0xe   : > { %s1315_s22 = scalar_select %p1119_p6, 1, 0 }
   0xf   : > { %s1316_s23 = scalar_select %p1123_p8, 1, 0 }
  0x10   : > { %s1317_s24 = scalar_select %p1128_p10, 1, 0 }
  0x11   : > { %p154_p11 = scmp.lt.s32.totalorder %s1039_s17, 3  ;;  %s1041_s26 = smov [#allocation3]  }
  0x12   : > { %1318 = sst [smem:[#allocation13_spill]] %s1317_s24  ;;  %s172_s27 = sshll.u32 %s1041_s26, 4  ;;  %s173_s27 = int_to_ptr.vmem [resolvable:$true] %s172_s27 }
  0x13   : > { %p1133_p12 = pnand %p696_p9, %p154_p11  ;;  %p833_p1 = scmp.lt.s32.totalorder %s1039_s17, 2 }
  0x14   : > { %s35_s30 = sadd.s32 1, %s1035_s16  ;;  %s912_s4 = scalar_lea.vmem %s173_s27, 1536 }
  0x15   : > { %p820_p13 = pneg %p1133_p12  ;;  %p1149_p2 = pnand %p833_p1, %p1113_p4 }
  0x16   : > { %p913_p9 = scmp.ne.s32.totalorder %s173_s27, %s912_s4  ;;  %p920_p0 = scmp.lt.s32.totalorder %s173_s27, %s173_s27 }
  0x17   : > { %p1143_p5 = pnand %p820_p13, %p1109_p3  ;;  %p921_p8 = scmp.lt.s32.totalorder %s912_s4, %s912_s4 }
  0x19   : > { %p903_p7 = pneg %p1143_p5  ;;  %p922_p6 = por %p921_p8, %p920_p0 }
  0x1b   : > { %p915_p11 = pnand %p913_p9, %p903_p7 }
  0x1d   : > { %p916_p10 = pneg %p915_p11 }
  0x1f   : > { %p923_p13 = pnand %p922_p6, %p916_p10 }
  0x21   : > { %926 = shalt.err (!%p923_p13)
}
  0x22   : > { %s1042_s5 = smov 384   ;;  %s1043_s6 = smov 24  }
  0x23   : > { %823 = dma.hbm_to_vmem [thread:$0]  (!%p1143_p5), %s1303_s0, 1536, %s173_s27, [#allocation4], %s1042_s5, %s1042_s5, %s1043_s6  }
  0x24   : > { %p37_p4 = scmp.ge.s32.totalorder %s35_s30, 2  ;;  %s76_s9 = sadd.s32 1, %s1027_s14 }
  0x25   : > { %s186_s10 = sand.u32 1, %s1027_s14   ;;  %s699_s19 = sshll.u32 %s1035_s16, 7 }
  0x26   : > { %s1334_s30 = smov (%p37_p4, %s35_s30), 0  ;;  %s810_s11 = smul.u32 384, %s186_s10 }
  0x27   : > { %s72_s18 = ssub.s32 %s1035_s16, %s1334_s30  ;;  %s198_s4 = scalar_lea.hbm %s1304_s1, %s699_s19 }
  0x28   : > { %p74_p6 = scmp.eq.s32.totalorder %s72_s18, 0  ;;  %s190_s28 = scalar_lea.vmem [#allocation6], %s810_s11 }
  0x29   : > { %s199_s17 = sshll.u32 %s190_s28, 4  ;;  %s187_s27 = scalar_lea.sflag [#allocation7], %s186_s10  ;;  %s200_s17 = int_to_ptr.vmem [resolvable:$true] %s199_s17 }
  0x2a   : > { %s1172_s24 = scalar_select %p74_p6, %s1027_s14, %s76_s9  }
  0x2b   : > { %p929_p8 = pneg %p1149_p2  ;;  %s940_s5 = scalar_lea.vmem %s200_s17, 6144 }
  0x2c   : > { %p941_p10 = scmp.ne.s32.totalorder %s200_s17, %s940_s5  ;;  %s1044_s6 = smov [#allocation6]  }
  0x2d   : > { %s945_s7 = sshll.u32 %s1044_s6, 4  ;;  %s946_s7 = int_to_ptr.vmem [resolvable:$false] %s945_s7 }
  0x2e   : > { %p943_p0 = pnand %p941_p10, %p929_p8  ;;  %s947_s8 = scalar_lea.vmem %s946_s7, 12288 }
  0x2f   : > { %p948_p5 = scmp.lt.s32.totalorder %s200_s17, %s946_s7  ;;  %p949_p7 = scmp.lt.s32.totalorder %s947_s8, %s940_s5 }
  0x30   : > { %p944_p1 = pneg %p943_p0 }
  0x31   : > { %p950_p9 = por %p949_p7, %p948_p5 }
  0x33   : > { %p951_p11 = pnand %p950_p9, %p944_p1 }
  0x35   : > { %954 = shalt.err (!%p951_p11)
}
  0x36   : > { %s1045_s11 = smov 256   ;;  %s1046_s9 = smov 128  }
  0x37   : > { %s1047_s18 = smov 8   ;;  %217 = sbr.rel (%p1133_p12) target bundleno = 355 (0x163), region = 32 }
  0x38   : > { %827 = dma.hbm_to_vmem [thread:$0]  (!%p1149_p2), %s198_s4, 6144, %s200_s17, %s187_s27, %s1045_s11, %s1046_s9, %s1047_s18  }
  0x3c   : > { %1006 = dma.done.wait (%p1109_p3), [#allocation4], 1536  }
  0x3d   : > { %1008 = vsyncadd (%p1109_p3), [#allocation4], 4294965760  ;;  %s1185_s10 = sand.u32 1, %s1023_s13   ;;  %p1322_p2 = scmp.ne.s32.totalorder %s1315_s22, 0 }
  0x3e   : > { %s811_s19 = smul.u32 384, %s1185_s10  ;;  %s224_s21 = scalar_lea.sflag [#allocation7], %s1185_s10 }
  0x40   : > { %s1189_s26 = scalar_lea.vmem [#allocation6], %s811_s19 }
  0x41   : > { %1010 = dma.done.wait (%p1322_p2), %s224_s21, 6144  }
  0x42   : > { %1012 = vsyncadd (%p1322_p2), %s224_s21, 4294961152  ;;  %v322_v0 = vld [vmem:[%s1189_s26 + $0xf8] sm:$0xff]  ;;  %v321_v2 = vld [vmem:[%s1189_s26 + $0xf0] sm:$0xff]  ;;  %p256_p3 = scmp.lt.s32.totalorder %s1031_s15, 1  ;;  %s702_s29 = sshll.u32 %s1185_s10, 5 }
  0x43   : > { %v306_v1 = vld [vmem:[%s1189_s26 + $0x78] sm:$0xff]  ;;  %708 = vmatprep.subr.mxu0 %v322_v0  ;;  %v305_v4 = vld [vmem:[%s1189_s26 + $0x70] sm:$0xff]  ;;  %v320_v5 = vld [vmem:[%s1189_s26 + $0xe8] sm:$0xff]  ;;  %s252_s4 = scalar_lea.vmem [#allocation8], %s702_s29  ;;  %s705_s28 = sshll.u32 %s1031_s15, 7 }
  0x44   : > { %v338_v3 = vld [vmem:[%s1189_s26 + $0x178] sm:$0xff]  ;;  %709 = vmatpush3.msra.mxu0 %v306_v1  ;;  %v337_v6 = vld [vmem:[%s1189_s26 + $0x170] sm:$0xff]  ;;  %v304_v7 = vld [vmem:[%s1189_s26 + $0x68] sm:$0xff]  ;;  %s257_s17 = scalar_select %p256_p3, %s1031_s15, 1 }
  0x45   : > { %772 = vmatprep.subr.mxu1 %v338_v3  ;;  %710 = vmatprep.subr.mxu0 %v321_v2  ;;  %v336_v8 = vld [vmem:[%s1189_s26 + $0x168] sm:$0xff]  ;;  %v319_v9 = vld [vmem:[%s1189_s26 + $0xe0] sm:$0xff]  ;;  %v318_v12 = vld [vmem:[%s1189_s26 + $0xd8] sm:$0xff]  ;;  %s580_s27 = sshll.u32 %s252_s4, 4  ;;  %s1253_s7 = scalar_lea.hbm %s1306_s3, %s705_s28  ;;  %s1255_s27 = int_to_ptr.vmem [resolvable:$true] %s580_s27 }
  0x46   : > { %773 = vmatpush3.msra.mxu1 %v338_v3  ;;  %711 = vmatpush3.msra.mxu0 %v305_v4  ;;  %v303_v10 = vld [vmem:[%s1189_s26 + $0x60] sm:$0xff]  ;;  %v302_v13 = vld [vmem:[%s1189_s26 + $0x58] sm:$0xff]  ;;  %v317_v15 = vld [vmem:[%s1189_s26 + $0xd0] sm:$0xff]  ;;  %s258_s25 = scalar_lea.vmem %s1305_s2, %s257_s17  ;;  %s565_s8 = scalar_lea.sflag [#allocation5], %s1185_s10 }
  0x47   : > { %774 = vmatprep.subr.mxu1 %v337_v6  ;;  %712 = vmatprep.subr.mxu0 %v320_v5  ;;  %v335_v11 = vld [vmem:[%s1189_s26 + $0x160] sm:$0xff]  ;;  %v334_v14 = vld [vmem:[%s1189_s26 + $0x158] sm:$0xff]  ;;  %v301_v16 = vld [vmem:[%s1189_s26 + $0x50] sm:$0xff]  ;;  %s955_s11 = scalar_lea.vmem %s1255_s27, 512  ;;  %p1323_p13 = scmp.ne.s32.totalorder %s1316_s23, 0 }
  0x48   : > { %775 = vmatpush3.msra.mxu1 %v337_v6  ;;  %713 = vmatpush3.msra.mxu0 %v304_v7  ;;  %v333_v17 = vld [vmem:[%s1189_s26 + $0x150] sm:$0xff]  ;;  %v316_v18 = vld [vmem:[%s1189_s26 + $0xc8] sm:$0xff]  ;;  %v315_v21 = vld [vmem:[%s1189_s26 + $0xc0] sm:$0xff]  ;;  %p956_p12 = scmp.ne.s32.totalorder %s1255_s27, %s955_s11  ;;  %s1048_s15 = smov [#allocation8]  }
  0x49   : > { %776 = vmatprep.subr.mxu1 %v336_v8  ;;  %714 = vmatprep.subr.mxu0 %v319_v9  ;;  %v300_v19 = vld [vmem:[%s1189_s26 + $0x48] sm:$0xff]  ;;  %v299_v22 = vld [vmem:[%s1189_s26 + $0x40] sm:$0xff]  ;;  %v314_v24 = vld [vmem:[%s1189_s26 + $0xb8] sm:$0xff]  ;;  %s959_s9 = sshll.u32 %s1048_s15, 4  ;;  %s960_s9 = int_to_ptr.vmem [resolvable:$false] %s959_s9 }
  0x4a   : > { %777 = vmatpush3.msra.mxu1 %v336_v8  ;;  %715 = vmatpush3.msra.mxu0 %v303_v10  ;;  %v332_v20 = vld [vmem:[%s1189_s26 + $0x148] sm:$0xff]  ;;  %v331_v23 = vld [vmem:[%s1189_s26 + $0x140] sm:$0xff]  ;;  %v298_v25 = vld [vmem:[%s1189_s26 + $0x38] sm:$0xff]  ;;  %p957_p4 = pnand %p956_p12, %p1323_p13  ;;  %s961_s18 = scalar_lea.vmem %s960_s9, 1024 }
  0x4b   : > { %778 = vmatprep.subr.mxu1 %v335_v11  ;;  %716 = vmatprep.subr.mxu0 %v318_v12  ;;  %v330_v26 = vld [vmem:[%s1189_s26 + $0x138] sm:$0xff]  ;;  %v313_v27 = vld [vmem:[%s1189_s26 + $0xb0] sm:$0xff]  ;;  %v312_v30 = vld [vmem:[%s1189_s26 + $0xa8] sm:$0xff]  ;;  %p962_p8 = scmp.lt.s32.totalorder %s1255_s27, %s960_s9  ;;  %p963_p10 = scmp.lt.s32.totalorder %s961_s18, %s955_s11 }
  0x4c   : > { %779 = vmatpush3.msra.mxu1 %v335_v11  ;;  %717 = vmatpush3.msra.mxu0 %v302_v13  ;;  %v297_v28 = vld [vmem:[%s1189_s26 + $0x30] sm:$0xff]  ;;  %v296_v31 = vld [vmem:[%s1189_s26 + $0x28] sm:$0xff]  ;;  %v311_v33 = vld [vmem:[%s1189_s26 + $0xa0] sm:$0xff]  ;;  %p958_p6 = pneg %p957_p4 }
  0x4d   : > { %780 = vmatprep.subr.mxu1 %v334_v14  ;;  %718 = vmatprep.subr.mxu0 %v317_v15  ;;  %v329_v29 = vld [vmem:[%s1189_s26 + $0x130] sm:$0xff]  ;;  %v328_v32 = vld [vmem:[%s1189_s26 + $0x128] sm:$0xff]  ;;  %v295_v34 = vld [vmem:[%s1189_s26 + $0x20] sm:$0xff]  ;;  %p964_p0 = por %p963_p10, %p962_p8 }
  0x4e   : > { %781 = vmatpush3.msra.mxu1 %v334_v14  ;;  %719 = vmatpush3.msra.mxu0 %v301_v16  ;;  %v327_v35 = vld [vmem:[%s1189_s26 + $0x120] sm:$0xff]  ;;  %v310_v36 = vld [vmem:[%s1189_s26 + $0x98] sm:$0xff]  ;;  %v309_v39 = vld [vmem:[%s1189_s26 + $0x90] sm:$0xff] }
  0x4f   : > { %782 = vmatprep.subr.mxu1 %v333_v17  ;;  %720 = vmatprep.subr.mxu0 %v316_v18  ;;  %v294_v37 = vld [vmem:[%s1189_s26 + $0x18] sm:$0xff]  ;;  %v293_v40 = vld [vmem:[%s1189_s26 + $0x10] sm:$0xff]  ;;  %v308_v42 = vld [vmem:[%s1189_s26 + $0x88] sm:$0xff]  ;;  %p965_p1 = pnand %p964_p0, %p958_p6 }
  0x50   : > { %783 = vmatpush3.msra.mxu1 %v333_v17  ;;  %721 = vmatpush3.msra.mxu0 %v300_v19  ;;  %v326_v38 = vld [vmem:[%s1189_s26 + $0x118] sm:$0xff]  ;;  %v325_v41 = vld [vmem:[%s1189_s26 + $0x110] sm:$0xff]  ;;  %v292_v43 = vld [vmem:[%s1189_s26 + $0x8] sm:$0xff] }
  0x51   : > { %784 = vmatprep.subr.mxu1 %v332_v20  ;;  %722 = vmatprep.subr.mxu0 %v315_v21  ;;  %v324_v44 = vld [vmem:[%s1189_s26 + $0x108] sm:$0xff]  ;;  %v307_v45 = vld [vmem:[%s1189_s26 + $0x80] sm:$0xff]  ;;  %v281_v50 = vld [vmem:[#allocation3 + $0x10] sm:$0xff] }
  0x52   : > { %785 = vmatpush3.msra.mxu1 %v332_v20  ;;  %723 = vmatpush3.msra.mxu0 %v299_v22  ;;  %v280_v46 = vld [vmem:[#allocation3 + $0x8] sm:$0xff]  ;;  %v291_v47 = vld [vmem:[%s1189_s26] sm:$0xff]  ;;  %v282_v54 = vld [vmem:[#allocation3 + $0x18] sm:$0xff] }
  0x53   : > { %786 = vmatprep.subr.mxu1 %v331_v23  ;;  %724 = vmatprep.subr.mxu0 %v314_v24  ;;  %v279_v48 = vld [vmem:[#allocation3] sm:$0xff]  ;;  %v284_v51 = vld [vmem:[#allocation3 + $0x28] sm:$0xff]  ;;  %v286_v55 = vld [vmem:[#allocation3 + $0x38] sm:$0xff] }
  0x54   : > { %787 = vmatpush3.msra.mxu1 %v331_v23  ;;  %725 = vmatpush3.msra.mxu0 %v298_v25  ;;  %v323_v49 = vld [vmem:[%s1189_s26 + $0x100] sm:$0xff]  ;;  %v290_v56 = vld [vmem:[#allocation3 + $0x58] sm:$0xff]  ;;  %v285_v57 = vld [vmem:[#allocation3 + $0x30] sm:$0xff] }
  0x55   : > { %788 = vmatprep.subr.mxu1 %v330_v26  ;;  %726 = vmatprep.subr.mxu0 %v313_v27  ;;  %v283_v52 = vld [vmem:[#allocation3 + $0x20] sm:$0xff]  ;;  %v289_v58 = vld [vmem:[#allocation3 + $0x50] sm:$0xff]  ;;  %v288_v59 = vld [vmem:[#allocation3 + $0x48] sm:$0xff] }
  0x56   : > { %789 = vmatpush3.msra.mxu1 %v330_v26  ;;  %727 = vmatpush3.msra.mxu0 %v297_v28  ;;  %v287_v53 = vld [vmem:[#allocation3 + $0x40] sm:$0xff] }
  0x57   : > { %790 = vmatprep.subr.mxu1 %v329_v29  ;;  %728 = vmatprep.subr.mxu0 %v312_v30  ;;  %v703_v1 = vld [vmem:[%s258_s25] ss:$0 sm:$0xff] }
  0x58   : > { %791 = vmatpush3.msra.mxu1 %v329_v29  ;;  %729 = vmatpush3.msra.mxu0 %v296_v31 }
  0x59   : > { %792 = vmatprep.subr.mxu1 %v328_v32  ;;  %730 = vmatprep.subr.mxu0 %v311_v33 }
  0x5a   : > { %793 = vmatpush3.msra.mxu1 %v328_v32  ;;  %731 = vmatpush3.msra.mxu0 %v295_v34 }
  0x5b   : > { %794 = vmatprep.subr.mxu1 %v327_v35  ;;  %732 = vmatprep.subr.mxu0 %v310_v36 }
  0x5c   : > { %795 = vmatpush3.msra.mxu1 %v327_v35  ;;  %733 = vmatpush3.msra.mxu0 %v294_v37 }
  0x5d   : > { %796 = vmatprep.subr.mxu1 %v326_v38  ;;  %734 = vmatprep.subr.mxu0 %v309_v39 }
  0x5e   : > { %797 = vmatpush3.msra.mxu1 %v326_v38  ;;  %735 = vmatpush3.msra.mxu0 %v293_v40 }
  0x5f   : > { %798 = vmatprep.subr.mxu1 %v325_v41  ;;  %736 = vmatprep.subr.mxu0 %v308_v42 }
  0x60   : > { %799 = vmatpush3.msra.mxu1 %v325_v41  ;;  %737 = vmatpush3.msra.mxu0 %v292_v43 }
  0x61   : > { %800 = vmatprep.subr.mxu1 %v324_v44  ;;  %738 = vmatprep.subr.mxu0 %v307_v45 }
  0x62   : > { %403 = vmatprep.mubr.f32.mxu0 %v280_v46  ;;  %739 = vmatpush3.msra.mxu0 %v291_v47 }
  0x63   : > { %801 = vmatpush3.msra.mxu1 %v324_v44  ;;  %404 = vmatmul.mubr.f32.vlgmr.msra.gmra.mxu0 %v279_v48 }
  0x64   : > { %802 = vmatprep.subr.mxu1 %v323_v49  ;;  %804 = vmatprep.mubr.f32.mxu1 %v281_v50 }
  0x65   : > { %803 = vmatpush3.msra.mxu1 %v323_v49  ;;  %408 = vmatprep.mubr.f32.mxu0 %v283_v52 }
  0x66   : > { %805 = vmatmul.mubr.f32.vlgmr.msra.gmra.mxu1 %v284_v51 }
  0x67   : > { %807 = vmatprep.mubr.f32.mxu1 %v287_v53  ;;  %409 = vmatmul.mubr.f32.gmra.mxu0 %v282_v54 }
  0x68   : > { %413 = vmatprep.mubr.f32.mxu0 %v286_v55 }
  0x6a   : > { %808 = vmatmul.mubr.f32.gmra.mxu1 %v290_v56 }
  0x6b   : > { %414 = vmatmul.mubr.f32.gmra.mxu0 %v285_v57 }
  0x6c   : > { %418 = vmatprep.mubr.f32.mxu0 %v289_v58 }
  0x6f   : > { %419 = vmatmul.mubr.f32.gmra.mxu0 %v288_v59 }
 0x123   : > { %v740_v60 = vpop.f32.mrf.mxu0 }
 0x125   : > { %v741_v61 = vpop.f32.mrf.mxu0 }
 0x126   : > { %v806_v62 = vpop.f32.mrf.mxu1  ;;  %v742_v63 = vadd.f32 %v741_v61, %v740_v60 }
 0x127   : > { %v743_v0 = vpop.f32.mrf.mxu0 }
 0x128   : > { %v490_v2 = vpop.f32.mrf.mxu1 }
 0x129   : > { %v491_v3 = vadd.f32 %v742_v63, %v490_v2  ;;  %v744_v4 = vpop.f32.mrf.mxu0 }
 0x12a   : > { %v809_v5 = vpop.f32.mrf.mxu1  ;;  %v745_v7 = vadd.f32 %v744_v4, %v743_v0 }
 0x12b   : > { %v509_v6 = vadd.f32 %v703_v1, %v491_v3  ;;  %v746_v8 = vpop.f32.mrf.mxu0 }
 0x12c   : > { %v496_v10 = vadd.f32 %v806_v62, %v745_v7  ;;  %v500_v12 = vpop.f32.mrf.mxu1 }
 0x12d   : > { %v528_v9 = vmul.f32 %v509_v6, %v509_v6  ;;  %v747_v11 = vpop.f32.mrf.mxu0  ;;  %v524_v42 = vmul.f32 0.5, %v509_v6 }
 0x12e   : > { %v510_v14 = vadd.f32 %v703_v1, %v496_v10  ;;  %v748_v15 = vadd.f32 %v747_v11, %v746_v8 }
 0x12f   : > { %v532_v13 = vmul.f32 %v528_v9, %v509_v6  ;;  %v749_v16 = vpop.f32.mrf.mxu0 }
 0x130   : > { %v529_v18 = vmul.f32 %v510_v14, %v510_v14  ;;  %v501_v19 = vadd.f32 %v748_v15, %v500_v12  ;;  %v525_v46 = vmul.f32 0.5, %v510_v14 }
 0x131   : > { %v536_v17 = vmul.f32 0.044715, %v532_v13  ;;  %v750_v20 = vpop.f32.mrf.mxu0 }
 0x132   : > { %v533_v22 = vmul.f32 %v529_v18, %v510_v14  ;;  %v511_v23 = vadd.f32 %v703_v1, %v501_v19  ;;  %v751_v24 = vadd.f32 %v750_v20, %v749_v16 }
 0x133   : > { %v540_v21 = vadd.f32 %v536_v17, %v509_v6 }
 0x134   : > { %v537_v26 = vmul.f32 0.044715, %v533_v22  ;;  %v530_v27 = vmul.f32 %v511_v23, %v511_v23  ;;  %v506_v28 = vadd.f32 %v809_v5, %v751_v24  ;;  %v526_v50 = vmul.f32 0.5, %v511_v23 }
 0x135   : > { %v544_v25 = vmul.f32 0.7978846, %v540_v21 }
 0x136   : > { %v541_v29 = vadd.f32 %v537_v26, %v510_v14  ;;  %v534_v30 = vmul.f32 %v530_v27, %v511_v23  ;;  %v512_v31 = vadd.f32 %v703_v1, %v506_v28 }
 0x137   : > { %893 = vtanh.f32 %v544_v25 }
 0x138   : > { %v545_v32 = vmul.f32 0.7978846, %v541_v29  ;;  %v538_v33 = vmul.f32 0.044715, %v534_v30  ;;  %v531_v34 = vmul.f32 %v512_v31, %v512_v31  ;;  %v527_v54 = vmul.f32 0.5, %v512_v31 }
 0x13a   : > { %895 = vtanh.f32 %v545_v32  ;;  %v542_v35 = vadd.f32 %v538_v33, %v511_v23  ;;  %v535_v36 = vmul.f32 %v531_v34, %v512_v31 }
 0x13c   : > { %v546_v37 = vmul.f32 0.7978846, %v542_v35  ;;  %v539_v38 = vmul.f32 0.044715, %v535_v36 }
 0x13e   : > { %897 = vtanh.f32 %v546_v37  ;;  %v543_v39 = vadd.f32 %v539_v38, %v512_v31 }
 0x140   : > { %v547_v40 = vmul.f32 0.7978846, %v543_v39 }
 0x142   : > { %899 = vtanh.f32 %v547_v40 }
 0x144   : > { %v894_v41 = vpop.eup %893 }
 0x145   : > { %v552_v43 = vadd.f32 1.0, %v894_v41 }
 0x147   : > { %v556_v44 = vmul.f32 %v552_v43, %v524_v42  ;;  %v896_v45 = vpop.eup %895 }
 0x148   : > { %v553_v47 = vadd.f32 1.0, %v896_v45 }
 0x149   : > { %560 = vst [vmem:[%s252_s4] sm:$0xff] %v556_v44 }
 0x14a   : > { %v557_v48 = vmul.f32 %v553_v47, %v525_v46 }
 0x14b   : > { %v898_v49 = vpop.eup %897 }
 0x14c   : > { %561 = vst [vmem:[%s252_s4 + $0x8] sm:$0xff] %v557_v48  ;;  %v554_v51 = vadd.f32 1.0, %v898_v49 }
 0x14e   : > { %v558_v52 = vmul.f32 %v554_v51, %v526_v50 }
 0x14f   : > { %v900_v53 = vpop.eup %899 }
 0x150   : > { %562 = vst [vmem:[%s252_s4 + $0x10] sm:$0xff] %v558_v52  ;;  %v555_v55 = vadd.f32 1.0, %v900_v53 }
 0x152   : > { %v559_v56 = vmul.f32 %v555_v55, %v527_v54 }
 0x154   : > { %563 = vst [vmem:[%s252_s4 + $0x18] sm:$0xff] %v559_v56 }
 0x155   : > { %968 = shalt.err (!%p965_p1)
}
 0x156   : > { %s969_s19 = scalar_lea.hbm %s1253_s7, 512  ;;  %s973_s17 = scalar_lea.hbm %s1306_s3, 1024 }
 0x157   : > { %p970_p5 = scmp.ne.s32.totalorder %s1253_s7, %s969_s19  ;;  %p974_p11 = scmp.lt.s32.totalorder %s1253_s7, %s1306_s3 }
 0x158   : > { %p975_p2 = scmp.lt.s32.totalorder %s973_s17, %s969_s19 }
 0x159   : > { %p971_p7 = pnand %p970_p5, %p1323_p13 }
 0x15a   : > { %p976_p3 = por %p975_p2, %p974_p11 }
 0x15b   : > { %p972_p9 = pneg %p971_p7 }
 0x15d   : > { %p977_p12 = pnand %p976_p3, %p972_p9 }
 0x15f   : > { %980 = shalt.err (!%p977_p12)
}
 0x160   : > { %s1049_s25 = smov 128   ;;  %s1050_s29 = smov 256  }
 0x161   : > { %s1051_s4 = smov 8  }
 0x162   : > { %818 = dma.vmem_to_hbm [thread:$0]  (%p1323_p13), %s1255_s27, 512, %s1253_s7, %s565_s8, %s1049_s25, %s1050_s29, %s1051_s4  }
 0x163 PF: > { %s1324_s28 = sld [smem:[#allocation13_spill]]  ;;  %s595_s6 = sand.u32 1, %s1019_s12  }
 0x164   : > { %s1325_s5 = sld [smem:[#allocation12_spill]]  ;;  %s596_s11 = scalar_lea.sflag [#allocation5], %s595_s6 }
 0x169   : > { %p1326_p4 = scmp.ne.s32.totalorder %s1324_s28, 0 }
 0x16a   : > { %p1327_p6 = scmp.ge.s32.totalorder %s1325_s5, 2 }
 0x16c   : > { %p829_p8 = pnand %p1327_p6, %p1326_p4 }
 0x16e   : > { %p830_p10 = pneg %p829_p8 }
 0x170   : > { %1014 = dma.done.wait (%p830_p10), %s596_s11, 512  }
 0x171   : > { %1016 = vsyncadd (%p830_p10), %s596_s11, 4294966784  ;;  %s20_s17 = sadd.s32 1, %s1325_s5   ;;  %s1328_s12 = smov %s1023_s13 }
 0x172   : > { %p17_p0 = scmp.ge.s32.totalorder %s20_s17, 4   ;;  %s1329_s13 = smov %s1027_s14 }
 0x173   : > { %s1330_s14 = smov %s1172_s24  ;;  %s1331_s15 = smov %s1035_s16 }
 0x174   : > { %s1332_s16 = smov %s1334_s30  ;;  %19 = sbr.rel (!%p17_p0) target bundleno = 7 (0x7), region = 94 }
 0x179   :  { %601 = vsyncpa [#allocation4], 1 }
 0x17a   :  { %603 = vsyncpa [#allocation4 + $0x1], 1 }
 0x17b   :  { %604 = vsyncpa [#allocation7], 1 }
 0x17c   :  { %606 = vsyncpa [#allocation7 + $0x1], 1 }
 0x17d   :  { %607 = vsyncpa [#allocation5], 1 }
 0x17e   :  { %609 = vsyncpa [#allocation5 + $0x1], 1 }

</bundles_post_ra>
